<compile_context>
chip_gen: v7x
topology: tpu7x:2x2x1
jax: 0.10.0
libtpu: 0.0.40
codegen_flags: <defaults>
</compile_context>

<pallas_src>
import functools

import jax
import jax.numpy as jnp
from jax import lax
from jax.experimental import pallas as pl
from jax.experimental.pallas import tpu as pltpu


# --------------------------------------------------------------------------- utils
def _cdiv(a: int, b: int) -> int:
    return -(-a // b)


def _round_up(x: int, m: int) -> int:
    return _cdiv(x, m) * m


def _pad_feature(d: int) -> int:
    # Lane-dense (multiple of 128); 256-align larger dims for the 256x256 MXUs.
    return _round_up(d, 256) if d >= 256 else _round_up(d, 128)


def _vmem_limit_bytes() -> int:
    """Generation-aware VMEM budget: ~100 MiB on 128 MiB parts, 48 MiB on v7x."""
    try:
        cap = int(pltpu.get_tpu_info().vmem_capacity_bytes)
    except Exception:
        cap = 64 * 1024 * 1024  # assume the smallest (v7x per-TC) if query fails
    if cap >= 128 * 1024 * 1024:
        return 100 * 1024 * 1024
    return 48 * 1024 * 1024


def _vmem_estimate(tm, Dp, th, Op, w_bytes, w_buf):
    """Rough per-step VMEM footprint used to size the hidden tile."""
    x_b = 2 * tm * Dp * w_bytes          # x tile (double buffered)
    w1_b = w_buf * Dp * th * w_bytes     # w1 tile
    b1_b = w_buf * th * 4                # f32 bias
    w2_b = w_buf * th * Op * w_bytes     # w2 tile
    b2_b = Op * 4
    out_b = 2 * tm * Op * 4              # out tile (double buffered, worst case f32)
    acc_b = tm * Op * 4                  # f32 accumulator scratch
    h_b = tm * th * (4 + w_bytes)        # f32 GELU intermediate + recast copy
    return int((x_b + w1_b + b1_b + w2_b + b2_b + out_b + acc_b + h_b) * 1.2)


def _block_spec(shape, index_map, single_buffer=False):
    """BlockSpec, single-buffered when its block index is constant over the grid."""
    if single_buffer and hasattr(pl, "Buffered"):
        try:
            return pl.BlockSpec(shape, index_map, pipeline_mode=pl.Buffered(1))
        except Exception:  # older JAX without pipeline_mode / Buffered
            pass
    return pl.BlockSpec(shape, index_map)


_SQRT_HALF = 0.7071067811865476


def _gelu_f32(x, approx):
    if approx:
        # tanh approximation -> EUP slot (unloads the VALU on v6e/v7x)
        return jax.nn.gelu(x, approximate=True)
    # nn.GELU() default: exact erf-based GELU (f32 epilogue).
    return 0.5 * x * (1.0 + lax.erf(x * _SQRT_HALF))


# --------------------------------------------------------------------------- kernel
def _mlp_kernel(x_ref, w1_ref, b1_ref, w2_ref, b2_ref, o_ref, acc_ref, *, approx_gelu):
    # x_ref : (tm, Dp)    w1_ref: (Dp, th)    b1_ref: (1, th) f32
    # w2_ref: (th, Op)    b2_ref: (1, Op) f32 o_ref: (tm, Op)  acc_ref: (tm, Op) f32
    k = pl.program_id(1)

    @pl.when(k == 0)
    def _():
        acc_ref[...] = jnp.zeros_like(acc_ref)

    # fc1 on this hidden tile; MXU operands stay in input dtype, accumulate in f32.
    h = jnp.dot(x_ref[...], w1_ref[...], preferred_element_type=jnp.float32)
    h = h + b1_ref[...]                 # f32 bias, broadcast over rows
    h = _gelu_f32(h, approx_gelu)       # f32 epilogue
    # drop1: identity (eval mode).  TODO(synk): training-mode dropout via pltpu.prng_*.

    # fc2 partial product for this hidden tile, accumulated in f32.
    h = h.astype(w2_ref.dtype)
    acc_ref[...] += jnp.dot(h, w2_ref[...], preferred_element_type=jnp.float32)

    @pl.when(k == pl.num_programs(1) - 1)
    def _():
        y = acc_ref[...] + b2_ref[...]
        # drop2: identity (eval mode).
        o_ref[...] = y.astype(o_ref.dtype)


# --------------------------------------------------------------------------- wrapper
def prepare_mlp_params(w1, b1, w2, b2, *, compute_dtype=None):
    """Pad/cast weights ONCE (off the per-call hot path). Returns a params dict."""
    D, H = w1.shape
    O = w2.shape[1]
    assert b1.shape == (H,) and w2.shape[0] == H and b2.shape == (O,)

    vmem_limit = _vmem_limit_bytes()
    tm_max = 512 if vmem_limit >= 96 * 1024 * 1024 else 256

    w_dtype = compute_dtype if compute_dtype is not None else w1.dtype
    w_bytes = jnp.dtype(w_dtype).itemsize

    Dp = _pad_feature(D)
    Op = _pad_feature(O)
    Hl = _pad_feature(H)

    # Pick the largest hidden tile that fits the VMEM budget (prefer full residency).
    budget = int(vmem_limit * 0.8)
    th = 128
    for cand in sorted({Hl, 4096, 2048, 1024, 512, 256, 128}, reverse=True):
        if cand > Hl:
            continue
        w_buf = 1 if cand == Hl else 2  # fully-resident weights get Buffered(1)
        if _vmem_estimate(tm_max, Dp, cand, Op, w_bytes, w_buf) <= budget:
            th = cand
            break
    Hp = _round_up(Hl, th)

    w1p = jnp.pad(w1, ((0, Dp - D), (0, Hp - H))).astype(w_dtype)
    w2p = jnp.pad(w2, ((0, Hp - H), (0, Op - O))).astype(w_dtype)
    # Biases cast to f32 once here (added onto the f32 accumulator in-kernel).
    b1p = jnp.pad(b1, (0, Hp - H)).astype(jnp.float32).reshape(1, Hp)
    b2p = jnp.pad(b2, (0, Op - O)).astype(jnp.float32).reshape(1, Op)

    return {
        "w1": w1p, "b1": b1p, "w2": w2p, "b2": b2p,
        "dims": (D, H, O),
        "th": th, "tm_max": tm_max, "vmem_limit": vmem_limit,
    }


@functools.partial(
    jax.jit,
    static_argnames=("in_dim", "out_dim", "th", "tm_max", "approx_gelu", "vmem_limit"),
)
def _mlp_forward(x, w1p, b1p, w2p, b2p, *, in_dim, out_dim, th, tm_max,
                 approx_gelu, vmem_limit):
    orig_shape = x.shape
    D = in_dim
    assert orig_shape[-1] == D
    Dp, Hp = w1p.shape
    Op = w2p.shape[1]

    x2 = x.reshape(-1, D)
    M = x2.shape[0]

    # Row tile: minimise M padding; keep >=2 tiles so the "parallel" M axis can
    # shard across v7x's two TensorCores.
    n_m = max(1, _cdiv(M, tm_max))
    if n_m == 1 and M >= 16:
        n_m = 2
    tm = _round_up(_cdiv(M, n_m), 8)
    n_m = _cdiv(M, tm)
    Mp = n_m * tm
    n_k = Hp // th

    # Only the activation is padded per call (weights were padded once in prep).
    x2p = jnp.pad(x2, ((0, Mp - M), (0, Dp - D))).astype(w1p.dtype)

    kernel = functools.partial(_mlp_kernel, approx_gelu=approx_gelu)
    resident = n_k == 1  # weight block indices constant over the whole grid

    out = pl.pallas_call(
        kernel,
        out_shape=jax.ShapeDtypeStruct((Mp, Op), x.dtype),
        grid_spec=pltpu.PrefetchScalarGridSpec(
            num_scalar_prefetch=0,
            grid=(n_m, n_k),
            in_specs=[
                _block_spec((tm, Dp), lambda i, k: (i, 0)),                       # x tile
                _block_spec((Dp, th), lambda i, k: (0, k), single_buffer=resident),  # w1
                _block_spec((1, th), lambda i, k: (0, k), single_buffer=resident),   # b1 f32
                _block_spec((th, Op), lambda i, k: (k, 0), single_buffer=resident),  # w2
                _block_spec((1, Op), lambda i, k: (0, 0), single_buffer=True),       # b2 f32
            ],
            out_specs=pl.BlockSpec((tm, Op), lambda i, k: (i, 0)),
            scratch_shapes=[pltpu.VMEM((tm, Op), jnp.float32)],
        ),
        compiler_params=pltpu.CompilerParams(
            dimension_semantics=("parallel", "arbitrary"),
            vmem_limit_bytes=vmem_limit,
        ),
    )(x2p, w1p, b1p, w2p, b2p)

    return out[:M, :out_dim].reshape(orig_shape[:-1] + (out_dim,))


def mlp_pallas(x, params, *, tm=None, approx_gelu=False):
    """x: (..., in_features); params: output of prepare_mlp_params."""
    D, H, O = params["dims"]
    return _mlp_forward(
        x, params["w1"], params["b1"], params["w2"], params["b2"],
        in_dim=D, out_dim=O, th=params["th"],
        tm_max=tm if tm is not None else params["tm_max"],
        approx_gelu=approx_gelu, vmem_limit=params["vmem_limit"],
    )


# --------------------------------------------------------------------------- reference
def init_mlp_params(key, in_features, hidden_features, out_features, dtype=jnp.float32):
    # Deterministic init mimicking nn.Linear's uniform(-1/sqrt(fan_in), 1/sqrt(fan_in)).
    k1, k2, k3, k4 = jax.random.split(key, 4)
    lim1 = 1.0 / (in_features ** 0.5)
    lim2 = 1.0 / (hidden_features ** 0.5)
    # Stored as (in, out), i.e. pre-transposed relative to torch's (out, in).
    w1 = jax.random.uniform(k1, (in_features, hidden_features), dtype, -lim1, lim1)
    b1 = jax.random.uniform(k2, (hidden_features,), dtype, -lim1, lim1)
    w2 = jax.random.uniform(k3, (hidden_features, out_features), dtype, -lim2, lim2)
    b2 = jax.random.uniform(k4, (out_features,), dtype, -lim2, lim2)
    return w1, b1, w2, b2


def mlp_reference(x, w1, b1, w2, b2):
    h = _gelu_f32(x @ w1 + b1, approx=False)
    return h @ w2 + b2


if __name__ == "__main__":
    key = jax.random.PRNGKey(0)
    kx, kp = jax.random.split(key)

    batch, seq, in_features = 2, 8, 32
    hidden_features, out_features = 64, 32

    x = jax.random.normal(kx, (batch, seq, in_features), dtype=jnp.float32)
    w1, b1, w2, b2 = init_mlp_params(kp, in_features, hidden_features, out_features)

    params = prepare_mlp_params(w1, b1, w2, b2)   # pad/cast once, off the hot path
    y = mlp_pallas(x, params)
    y = jax.block_until_ready(y)

    y_ref = mlp_reference(x, w1, b1, w2, b2)
    assert y.shape == (batch, seq, out_features)
    assert jnp.allclose(y, y_ref, atol=1e-4, rtol=1e-4), "mismatch vs reference"

    print("KERNEL_OK")
</pallas_src>

<mosaic_0001>
module attributes {stable_mosaic.version = 11 : i64} {
  func.func @_mlp_kernel(%arg0: i32, %arg1: i32, %arg2: memref<8x128xf32, #tpu.memory_space<vmem>>, %arg3: memref<128x128xf32, #tpu.memory_space<vmem>>, %arg4: memref<1x128xf32, #tpu.memory_space<vmem>>, %arg5: memref<128x128xf32, #tpu.memory_space<vmem>>, %arg6: memref<1x128xf32, #tpu.memory_space<vmem>>, %arg7: memref<8x128xf32, #tpu.memory_space<vmem>>, %arg8: memref<8x128xf32, #tpu.memory_space<vmem>>) attributes {dimension_semantics = [#tpu.dimension_semantics<parallel>, #tpu.dimension_semantics<arbitrary>], iteration_bounds = array<i64: 2, 1>, scalar_prefetch = 0 : i64, scratch_operands = 1 : i64, tpu.core_type = #tpu.core_type<tc>, window_params = [{transform_indices = @transform_0, window_bounds = array<i64: 8, 128>}, {pipeline_mode = #tpu.pipeline_mode<synchronous>, transform_indices = @transform_1, window_bounds = array<i64: 128, 128>}, {pipeline_mode = #tpu.pipeline_mode<synchronous>, transform_indices = @transform_2, window_bounds = array<i64: 1, 128>}, {pipeline_mode = #tpu.pipeline_mode<synchronous>, transform_indices = @transform_3, window_bounds = array<i64: 128, 128>}, {pipeline_mode = #tpu.pipeline_mode<synchronous>, transform_indices = @transform_4, window_bounds = array<i64: 1, 128>}, {transform_indices = @transform_5, window_bounds = array<i64: 8, 128>}]} {
    %c0_i32 = arith.constant 0 : i32
    %0 = arith.cmpi eq, %arg1, %c0_i32 : i32
    %1 = arith.extui %0 : i1 to i32
    %c0_i32_0 = arith.constant 0 : i32
    %2 = arith.cmpi ne, %1, %c0_i32_0 : i32
    scf.if %2 {
      %cst_18 = arith.constant 0.000000e+00 : f32
      %25 = vector.broadcast %cst_18 : f32 to vector<8x128xf32>
      %c0_19 = arith.constant 0 : index
      %c0_20 = arith.constant 0 : index
      %26 = vector.load %arg8[%c0_19, %c0_20] : memref<8x128xf32, #tpu.memory_space<vmem>>, vector<8x128xf32>
      tpu.vector_store %arg8[%c0_19, %c0_20], %25 {strides = array<i32>} : memref<8x128xf32, #tpu.memory_space<vmem>>, vector<8x128xf32>,
    } else {
    }
    %c0 = arith.constant 0 : index
    %c0_1 = arith.constant 0 : index
    %3 = vector.load %arg2[%c0, %c0_1] : memref<8x128xf32, #tpu.memory_space<vmem>>, vector<8x128xf32>
    %c0_2 = arith.constant 0 : index
    %c0_3 = arith.constant 0 : index
    %4 = vector.load %arg3[%c0_2, %c0_3] : memref<128x128xf32, #tpu.memory_space<vmem>>, vector<128x128xf32>
    %cst = arith.constant dense<0.000000e+00> : vector<8x128xf32>
    %5 = tpu.matmul %3, %4, %cst {dimension_numbers = #tpu.dot_dimension_numbers<[1], [0], [0], [1], [0, 0, 1, 1], [], []>} : vector<8x128xf32>, vector<128x128xf32>, vector<8x128xf32> -> vector<8x128xf32>
    %c0_4 = arith.constant 0 : index
    %c0_5 = arith.constant 0 : index
    %6 = vector.load %arg4[%c0_4, %c0_5] : memref<1x128xf32, #tpu.memory_space<vmem>>, vector<1x128xf32>
    %7 = vector.broadcast %6 : vector<1x128xf32> to vector<8x128xf32>
    %8 = arith.addf %5, %7 : vector<8x128xf32>
    %cst_6 = arith.constant 5.000000e-01 : f32
    %9 = vector.broadcast %cst_6 : f32 to vector<8x128xf32>
    %10 = arith.mulf %9, %8 : vector<8x128xf32>
    %cst_7 = arith.constant 0.707106769 : f32
    %11 = vector.broadcast %cst_7 : f32 to vector<8x128xf32>
    %12 = arith.mulf %8, %11 : vector<8x128xf32>
    %13 = math.erf %12 : vector<8x128xf32>
    %cst_8 = arith.constant 1.000000e+00 : f32
    %14 = vector.broadcast %cst_8 : f32 to vector<8x128xf32>
    %15 = arith.addf %14, %13 : vector<8x128xf32>
    %16 = arith.mulf %10, %15 : vector<8x128xf32>
    %c0_9 = arith.constant 0 : index
    %c0_10 = arith.constant 0 : index
    %17 = vector.load %arg8[%c0_9, %c0_10] : memref<8x128xf32, #tpu.memory_space<vmem>>, vector<8x128xf32>
    %c0_11 = arith.constant 0 : index
    %c0_12 = arith.constant 0 : index
    %18 = vector.load %arg5[%c0_11, %c0_12] : memref<128x128xf32, #tpu.memory_space<vmem>>, vector<128x128xf32>
    %cst_13 = arith.constant dense<0.000000e+00> : vector<8x128xf32>
    %19 = tpu.matmul %16, %18, %cst_13 {dimension_numbers = #tpu.dot_dimension_numbers<[1], [0], [0], [1], [0, 0, 1, 1], [], []>} : vector<8x128xf32>, vector<128x128xf32>, vector<8x128xf32> -> vector<8x128xf32>
    %20 = arith.addf %17, %19 : vector<8x128xf32>
    %c0_14 = arith.constant 0 : index
    %c0_15 = arith.constant 0 : index
    %21 = vector.load %arg8[%c0_14, %c0_15] : memref<8x128xf32, #tpu.memory_space<vmem>>, vector<8x128xf32>
    tpu.vector_store %arg8[%c0_14, %c0_15], %20 {strides = array<i32>} : memref<8x128xf32, #tpu.memory_space<vmem>>, vector<8x128xf32>,
    %c0_i32_16 = arith.constant 0 : i32
    %22 = arith.cmpi eq, %arg1, %c0_i32_16 : i32
    %23 = arith.extui %22 : i1 to i32
    %c0_i32_17 = arith.constant 0 : i32
    %24 = arith.cmpi ne, %23, %c0_i32_17 : i32
    scf.if %24 {
      %c0_18 = arith.constant 0 : index
      %c0_19 = arith.constant 0 : index
      %25 = vector.load %arg8[%c0_18, %c0_19] : memref<8x128xf32, #tpu.memory_space<vmem>>, vector<8x128xf32>
      %c0_20 = arith.constant 0 : index
      %c0_21 = arith.constant 0 : index
      %26 = vector.load %arg6[%c0_20, %c0_21] : memref<1x128xf32, #tpu.memory_space<vmem>>, vector<1x128xf32>
      %27 = vector.broadcast %26 : vector<1x128xf32> to vector<8x128xf32>
      %28 = arith.addf %25, %27 : vector<8x128xf32>
      %c0_22 = arith.constant 0 : index
      %c0_23 = arith.constant 0 : index
      %29 = vector.load %arg7[%c0_22, %c0_23] : memref<8x128xf32, #tpu.memory_space<vmem>>, vector<8x128xf32>
      tpu.vector_store %arg7[%c0_22, %c0_23], %28 {strides = array<i32>} : memref<8x128xf32, #tpu.memory_space<vmem>>, vector<8x128xf32>,
    } else {
    }
    return
  }
  func.func @transform_0(%arg0: i32, %arg1: i32) -> (i32, i32) {
    %c0_i32 = arith.constant 0 : i32
    %c0_i32_0 = arith.constant 0 : i32
    return %arg0, %c0_i32 : i32, i32
  }
  func.func @transform_1(%arg0: i32, %arg1: i32) -> (i32, i32) {
    %c0_i32 = arith.constant 0 : i32
    %c0_i32_0 = arith.constant 0 : i32
    return %c0_i32, %arg1 : i32, i32
  }
  func.func @transform_2(%arg0: i32, %arg1: i32) -> (i32, i32) {
    %c0_i32 = arith.constant 0 : i32
    %c0_i32_0 = arith.constant 0 : i32
    return %c0_i32, %arg1 : i32, i32
  }
  func.func @transform_3(%arg0: i32, %arg1: i32) -> (i32, i32) {
    %c0_i32 = arith.constant 0 : i32
    %c0_i32_0 = arith.constant 0 : i32
    return %arg1, %c0_i32 : i32, i32
  }
  func.func @transform_4(%arg0: i32, %arg1: i32) -> (i32, i32) {
    %c0_i32 = arith.constant 0 : i32
    %c0_i32_0 = arith.constant 0 : i32
    %c0_i32_1 = arith.constant 0 : i32
    return %c0_i32, %c0_i32_0 : i32, i32
  }
  func.func @transform_5(%arg0: i32, %arg1: i32) -> (i32, i32) {
    %c0_i32 = arith.constant 0 : i32
    %c0_i32_0 = arith.constant 0 : i32
    return %arg0, %c0_i32 : i32, i32
  }
}

</mosaic_0001>

<bundles_post_ra>
// kernel: _mlp_forward.1
= control target key start
LH: loop header
LB: loop body
LE: loop exit
PB: predicated region body
PF: predicated region fallthrough
CT: control target
= control target key end

     0   :  { %10 = vsyncpa [#allocation4], 0  ;;  %s1085_s0 = inlined_call_operand.vmem [shape: f32[16,128], index: 0, kind: input, shape index: {}]   ;;  %s1086_s1 = inlined_call_operand.hbm [shape: f32[128,128], index: 1, kind: input, shape index: {}]   ;;  %s1087_s2 = inlined_call_operand.vmem [shape: f32[1,128], index: 2, kind: input, shape index: {}]   ;;  %s1088_s3 = inlined_call_operand.hbm [shape: f32[128,128], index: 3, kind: input, shape index: {}]   ;;  %s1089_s4 = inlined_call_operand.vmem [shape: f32[1,128], index: 4, kind: input, shape index: {}]   ;;  %s1090_s5 = inlined_call_operand.vmem [shape: f32[16,128], index: 5, kind: output, shape index: {}]  }
   0x1   :  { %11 = vsyncpa [#allocation6], 0  ;;  %s943_s18 = smov 0   ;;  %s945_s19 = smov 0  }
   0x2   :  { %s947_s20 = smov 0  }
   0x3 LB: > { %s598_s21 = sadd.s32 4294967295, %s904_s20   ;;  %s29_s22 = sadd.s32 1, %s900_s19  ;;  %s904_s20 = sphi %s947_s20, %s17_s20   ;;  %s900_s19 = sphi %s945_s19, %s1100_s19   ;;  %s896_s18 = sphi %s943_s18, %s1099_s18  }
   0x4   : > { %p31_p0 = scmp.ge.s32.totalorder %s29_s22, 2  ;;  %p600_p1 = scmp.ge.s32.totalorder %s904_s20, 1 }
   0x5   : > { %p185_p2 = scmp.lt.s32.totalorder %s904_s20, 3  ;;  %p968_p4 = scmp.eq.s32.totalorder %s598_s21, 0 }
   0x6   : > { %s1102_s22 = smov (%p31_p0, %s29_s22), 0  ;;  %s906_s25 = smov [#allocation3]  }
   0x7   : > { %p964_p3 = pnand %p600_p1, %p185_p2  ;;  %s199_s26 = sshll.u32 %s906_s25, 4  ;;  %s200_s26 = int_to_ptr.vmem [resolvable:$true] %s199_s26 }
   0x8   : > { %s1095_s24 = scalar_select %p968_p4, 1, 0 }
   0x9   : > { %s1094_s23 = scalar_select %p964_p3, 1, 0 }
   0xa   : > { %p774_p5 = pneg %p964_p3  ;;  %s907_s28 = smov [#allocation5]  }
   0xb   : > { %s221_s29 = sshll.u32 %s907_s28, 4  ;;  %s818_s7 = scalar_lea.hbm %s1086_s1, 2048  ;;  %s980_s29 = int_to_ptr.vmem [resolvable:$true] %s221_s29 }
   0xc   : > { %p976_p6 = pnand %p968_p4, %p774_p5  ;;  %p819_p7 = scmp.ne.s32.totalorder %s1086_s1, %s818_s7 }
   0xd   : > { %p825_p11 = scmp.lt.u32.totalorder %s818_s7, %s1086_s1 }
   0xe   : > { %p820_p8 = pneg %p976_p6 }
  0x10   : > { %p821_p9 = pnand %p820_p8, %p819_p7 }
  0x12   : > { %p822_p10 = pneg %p821_p9 }
  0x14   : > { %p827_p12 = pnand %p825_p11, %p822_p10 }
  0x16   : > { %830 = shalt.err (!%p827_p12)
}
  0x17   : > { %s831_s12 = scalar_lea.vmem %s200_s26, 2048  ;;  %p839_p2 = scmp.lt.s32.totalorder %s200_s26, %s200_s26 }
  0x18   : > { %p832_p13 = scmp.ne.s32.totalorder %s200_s26, %s831_s12  ;;  %p840_p5 = scmp.lt.s32.totalorder %s831_s12, %s831_s12 }
  0x1a   : > { %p834_p0 = pnand %p832_p13, %p820_p8  ;;  %p841_p4 = por %p840_p5, %p839_p2 }
  0x1c   : > { %p835_p1 = pneg %p834_p0 }
  0x1e   : > { %p842_p3 = pnand %p841_p4, %p835_p1 }
  0x20   : > { %845 = shalt.err (!%p842_p3)
}
  0x21   : > { %s908_s13 = smov 128   ;;  %s909_s14 = smov 8  }
  0x22   : > { %777 = dma.hbm_to_vmem [thread:$0]  (!%p976_p6), %s1086_s1, 2048, %s200_s26, [#allocation4], %s908_s13, %s908_s13, %s909_s14  }
  0x23   : > { %s846_s25 = scalar_lea.hbm %s1088_s3, 2048 }
  0x24   : > { %p847_p7 = scmp.ne.s32.totalorder %s1088_s3, %s846_s25  ;;  %p853_p9 = scmp.lt.u32.totalorder %s846_s25, %s1088_s3 }
  0x26   : > { %p849_p3 = pnand %p847_p7, %p820_p8 }
  0x28   : > { %p850_p4 = pneg %p849_p3 }
  0x2a   : > { %p855_p10 = pnand %p853_p9, %p850_p4 }
  0x2c   : > { %858 = shalt.err (!%p855_p10)
}
  0x2d   : > { %s859_s26 = scalar_lea.vmem %s980_s29, 2048  ;;  %p867_p0 = scmp.lt.s32.totalorder %s980_s29, %s980_s29 }
  0x2e   : > { %p860_p11 = scmp.ne.s32.totalorder %s980_s29, %s859_s26  ;;  %p868_p1 = scmp.lt.s32.totalorder %s859_s26, %s859_s26 }
  0x30   : > { %p862_p12 = pnand %p860_p11, %p820_p8  ;;  %p869_p2 = por %p868_p1, %p867_p0 }
  0x32   : > { %p863_p13 = pneg %p862_p12 }
  0x34   : > { %p870_p5 = pnand %p869_p2, %p863_p13 }
  0x36   : > { %873 = shalt.err (!%p870_p5)
}
  0x37   : > { %780 = dma.hbm_to_vmem [thread:$0]  (!%p976_p6), %s1088_s3, 2048, %s980_s29, [#allocation6], %s908_s13, %s908_s13, %s909_s14  }
  0x38   : > { %p1097_p7 = scmp.ne.s32.totalorder %s1094_s23, 0 }
  0x39   : > { %p1098_p3 = scmp.ne.s32.totalorder (!%p1097_p7), %s1095_s24, 0 }
  0x3a   : > { %247 = sbr.rel (%p1097_p7) target bundleno = 549 (0x225), region = 40 }
  0x41   : > { %887 = dma.done.wait (%p1098_p3), [#allocation4], 2048  }
  0x42   : > { %889 = vsyncadd (%p1098_p3), [#allocation4], 4294965248 }
  0x43   : > { %891 = dma.done.wait (%p1098_p3), [#allocation6], 2048  }
  0x44   : > { %893 = vsyncadd (%p1098_p3), [#allocation6], 4294965248  ;;  %v910_v0 = vmov 0.0|0.0   ;;  %vm911_vm0 = vmmov 0   ;;  %v912_v1 = vmov 0.0   ;;  %v298_v2 = vld [vmem:[#allocation3] sm:$0xff] }
  0x45   : > { %718 = vmatprep.subr.bf16.mxu0 %v910_v0  ;;  %680 = vmatprep.mubr.msk.f32.mxu0 %vm911_vm0, %v912_v1  ;;  %v299_v3 = vld [vmem:[#allocation3 + $0x8] sm:$0xff]  ;;  %v300_v4 = vld [vmem:[#allocation3 + $0x10] sm:$0xff]  ;;  %v301_v6 = vld [vmem:[#allocation3 + $0x18] sm:$0xff]  ;;  %p280_p6 = scmp.lt.s32.totalorder %s896_s18, 1 }
  0x46   : > { %742 = vmatprep.subr.bf16.mxu1 %v910_v0  ;;  %715 = vmatprep.mubr.msk.f32.mxu1 %vm911_vm0, %v912_v1  ;;  %v719_v5 = vpack.c.bf16 %v299_v3, %v298_v2  ;;  %v722_v7 = vpack.c.bf16 %v301_v6, %v300_v4  ;;  %v302_v8 = vld [vmem:[#allocation3 + $0x20] sm:$0xff]  ;;  %v303_v9 = vld [vmem:[#allocation3 + $0x28] sm:$0xff]  ;;  %v399_v12 = vld [vmem:[#allocation5 + $0x10] sm:$0xff] }
  0x47   : > { %v397_v10 = vld [vmem:[#allocation5] sm:$0xff]  ;;  %v398_v11 = vld [vmem:[#allocation5 + $0x8] sm:$0xff]  ;;  %v400_v13 = vld [vmem:[#allocation5 + $0x18] sm:$0xff]  ;;  %v725_v14 = vpack.c.bf16 %v303_v9, %v302_v8  ;;  %s1104_s18 = smov (!%p280_p6, %s896_s18), 1 }
  0x48   : > { %720 = vmatpush3.bf16.msra.mxu0 %v719_v5  ;;  %v743_v15 = vpack.c.bf16 %v398_v11, %v397_v10  ;;  %v304_v16 = vld [vmem:[#allocation3 + $0x30] sm:$0xff]  ;;  %v305_v17 = vld [vmem:[#allocation3 + $0x38] sm:$0xff]  ;;  %v746_v18 = vpack.c.bf16 %v400_v13, %v399_v12  ;;  %v401_v19 = vld [vmem:[#allocation5 + $0x20] sm:$0xff]  ;;  %s608_s23 = sshll.u32 %s1104_s18, 3 }
  0x49   : > { %721 = vmatprep.subr.bf16.mxu0 %v910_v0  ;;  %v402_v20 = vld [vmem:[#allocation5 + $0x28] sm:$0xff]  ;;  %v728_v21 = vpack.c.bf16 %v305_v17, %v304_v16  ;;  %v306_v22 = vld [vmem:[#allocation3 + $0x40] sm:$0xff]  ;;  %v308_v26 = vld [vmem:[#allocation3 + $0x50] sm:$0xff]  ;;  %s283_s29 = scalar_lea.vmem %s1085_s0, %s608_s23  ;;  %s291_s16 = scalar_lea.vmem %s1090_s5, %s608_s23 }
  0x4a   : > { %744 = vmatpush3.bf16.msra.mxu1 %v743_v15  ;;  %v307_v23 = vld [vmem:[#allocation3 + $0x48] sm:$0xff]  ;;  %v749_v24 = vpack.c.bf16 %v402_v20, %v401_v19  ;;  %v309_v27 = vld [vmem:[#allocation3 + $0x58] sm:$0xff]  ;;  %v310_v29 = vld [vmem:[#allocation3 + $0x60] sm:$0xff] }
  0x4b   : > { %745 = vmatprep.subr.bf16.mxu1 %v910_v0  ;;  %v731_v25 = vpack.c.bf16 %v307_v23, %v306_v22  ;;  %v734_v28 = vpack.c.bf16 %v309_v27, %v308_v26  ;;  %v311_v30 = vld [vmem:[#allocation3 + $0x68] sm:$0xff]  ;;  %v312_v32 = vld [vmem:[#allocation3 + $0x70] sm:$0xff]  ;;  %v313_v33 = vld [vmem:[#allocation3 + $0x78] sm:$0xff] }
  0x4c   : > { %723 = vmatpush3.bf16.msra.mxu0 %v722_v7  ;;  %v737_v31 = vpack.c.bf16 %v311_v30, %v310_v29  ;;  %v740_v34 = vpack.c.bf16 %v313_v33, %v312_v32  ;;  %v297_v35 = vld [vmem:[%s283_s29] sm:$0xff]  ;;  %v403_v36 = vld [vmem:[#allocation5 + $0x30] sm:$0xff]  ;;  %v404_v37 = vld [vmem:[#allocation5 + $0x38] sm:$0xff] }
  0x4d   : > { %724 = vmatprep.subr.bf16.mxu0 %v910_v0  ;;  %v752_v38 = vpack.c.bf16 %v404_v37, %v403_v36  ;;  %v405_v39 = vld [vmem:[#allocation5 + $0x40] sm:$0xff]  ;;  %v406_v40 = vld [vmem:[#allocation5 + $0x48] sm:$0xff]  ;;  %v407_v42 = vld [vmem:[#allocation5 + $0x50] sm:$0xff] }
  0x4e   : > { %747 = vmatpush3.bf16.msra.mxu1 %v746_v18  ;;  %v755_v41 = vpack.c.bf16 %v406_v40, %v405_v39  ;;  %v408_v43 = vld [vmem:[#allocation5 + $0x58] sm:$0xff]  ;;  %v409_v45 = vld [vmem:[#allocation5 + $0x60] sm:$0xff]  ;;  %v410_v46 = vld [vmem:[#allocation5 + $0x68] sm:$0xff] }
  0x4f   : > { %748 = vmatprep.subr.bf16.mxu1 %v910_v0  ;;  %v758_v44 = vpack.c.bf16 %v408_v43, %v407_v42  ;;  %v761_v47 = vpack.c.bf16 %v410_v46, %v409_v45  ;;  %v411_v48 = vld [vmem:[#allocation5 + $0x70] sm:$0xff]  ;;  %v412_v49 = vld [vmem:[#allocation5 + $0x78] sm:$0xff]  ;;  %v610_v51 = vld [vmem:[%s1087_s2] ss:$0 sm:$0xff] }
  0x50   : > { %726 = vmatpush3.bf16.msra.mxu0 %v725_v14  ;;  %v764_v50 = vpack.c.bf16 %v412_v49, %v411_v48  ;;  %v611_v60 = vld [vmem:[%s1089_s4] ss:$0 sm:$0xff] }
  0x51   : > { %727 = vmatprep.subr.bf16.mxu0 %v910_v0 }
  0x52   : > { %750 = vmatpush3.bf16.msra.mxu1 %v749_v24 }
  0x53   : > { %751 = vmatprep.subr.bf16.mxu1 %v910_v0 }
  0x54   : > { %729 = vmatpush3.bf16.msra.mxu0 %v728_v21 }
  0x55   : > { %730 = vmatprep.subr.bf16.mxu0 %v910_v0 }
  0x56   : > { %753 = vmatpush3.bf16.msra.mxu1 %v752_v38 }
  0x57   : > { %754 = vmatprep.subr.bf16.mxu1 %v910_v0 }
  0x58   : > { %732 = vmatpush3.bf16.msra.mxu0 %v731_v25 }
  0x59   : > { %733 = vmatprep.subr.bf16.mxu0 %v910_v0 }
  0x5a   : > { %756 = vmatpush3.bf16.msra.mxu1 %v755_v41 }
  0x5b   : > { %757 = vmatprep.subr.bf16.mxu1 %v910_v0 }
  0x5c   : > { %735 = vmatpush3.bf16.msra.mxu0 %v734_v28 }
  0x5d   : > { %736 = vmatprep.subr.bf16.mxu0 %v910_v0 }
  0x5e   : > { %759 = vmatpush3.bf16.msra.mxu1 %v758_v44 }
  0x5f   : > { %760 = vmatprep.subr.bf16.mxu1 %v910_v0 }
  0x60   : > { %738 = vmatpush3.bf16.msra.mxu0 %v737_v31 }
  0x61   : > { %739 = vmatprep.subr.bf16.mxu0 %v910_v0 }
  0x62   : > { %762 = vmatpush3.bf16.msra.mxu1 %v761_v47 }
  0x63   : > { %763 = vmatprep.subr.bf16.mxu1 %v910_v0 }
  0x64   : > { %741 = vmatpush3.bf16.msra.mxu0 %v740_v34 }
  0x66   : > { %765 = vmatpush3.bf16.msra.mxu1 %v764_v50 }
  0x67   : > { %681 = vmatmul.mubr.f32.vlgmr.msra.gmra.mrb[0].mxu0 %v297_v35 }
 0x13a   : > { %v387_v52 = vpop.f32.mrb[0].mxu0 }
 0x13b   : > { %v388_v53 = vadd.f32 %v610_v51, %v387_v52  ;;  %v682_v54 = vpop.f32.mrb[1].mxu0 }
 0x13d   : > { %v392_v55 = vmul.f32 0.70710677, %v388_v53  ;;  %v391_v57 = vmul.f32 0.5, %v388_v53 }
 0x13f   : > { %816 = verf.f32 %v392_v55 }
 0x149   : > { %v817_v56 = vpop.eup %816 }
 0x14a   : > { %v394_v58 = vadd.f32 1.0, %v817_v56 }
 0x14c   : > { %v395_v59 = vmul.f32 %v394_v58, %v391_v57 }
 0x14e   : > { %716 = vmatmul.mubr.f32.vlgmr.msra.gmra.mrb[0].mxu1 %v395_v59 }
 0x221   : > { %v479_v61 = vpop.f32.mrb[0].mxu1 }
 0x222   : > { %v496_v62 = vadd.f32 %v611_v60, %v479_v61  ;;  %v717_v63 = vpop.f32.mrb[1].mxu1 }
 0x224   : > { %497 = vst [vmem:[%s291_s16] sm:$0xff] %v496_v62 }
 0x225 PF: > { %s17_s20 = sadd.s32 1, %s904_s20   ;;  %s1099_s18 = smov %s900_s19 }
 0x226   : > { %p14_p8 = scmp.ge.s32.totalorder %s17_s20, 4   ;;  %s1100_s19 = smov %s1102_s22 }
 0x228   :  { %16 = sbr.rel (!%p14_p8) target bundleno = 3 (0x3), region = 92 }
 0x22f   :  { %517 = vsyncpa [#allocation4], 1 }
 0x230   :  { %519 = vsyncpa [#allocation4 + $0x1], 1 }
 0x231   :  { %520 = vsyncpa [#allocation6], 1 }

</bundles_post_ra>
